<compile_context>
chip_gen: v6e
topology: v6e:2x2x1
jax: 0.10.0
libtpu: 0.0.40
codegen_flags: <defaults>
</compile_context>

<pallas_src>
import math

import jax
import jax.numpy as jnp
from jax.experimental import pallas as pl
from jax.experimental.pallas import tpu as pltpu

# ----------------------------- model config --------------------------------
HIDDEN = 32                 # hidden_size (embedding dim)
STATE_SIZE = 8              # sequence length
ITEM_NUM = 50               # vocab size; padding id == ITEM_NUM
NUM_FILTERS = 16            # num_filters per horizontal conv
FILTER_SIZES = [2, 3, 4]    # filter_sizes (eval'd string in the torch module)
BATCH = 2
DROPOUT_RATE = 0.1          # dropout is identity in eval mode

NUM_FILTERS_TOTAL = NUM_FILTERS * len(FILTER_SIZES)     # 48
FINAL_DIM = HIDDEN + NUM_FILTERS_TOTAL                  # 80
SH = STATE_SIZE * HIDDEN                                # 256 (lane-dense emb)
LANE = 128
T_POOL = STATE_SIZE - min(FILTER_SIZES) + 1             # 7 pooling time blocks


def _round_up(x, m):
    return ((x + m - 1) // m) * m


FEAT_PAD = _round_up(FINAL_DIM, LANE)                   # 128 (fc contraction)
ITEM_PAD = _round_up(ITEM_NUM, LANE)                    # 128 (lane-dense output)
MAX_BATCH_TILE = 1024                                   # ~3 MB/tile after restructure


# ------------------------------ Pallas kernel -------------------------------
def caser_kernel(emb_ref, wconv_ref, wfc_ref, fbias_ref, bfc_ref, out_ref):
    """One batch tile: packed conv matmul -> dense max-pool -> bias+ReLU -> fc."""
    emb = emb_ref[...]                                            # (TB, S*H)

    # All horizontal + vertical convs at all pooling times: one MXU pass.
    raw = jnp.dot(emb, wconv_ref[...],
                  preferred_element_type=jnp.float32)             # (TB, T_POOL*128)

    # Dense max-pool over time: 128-lane-aligned static slices.
    pooled = raw[:, 0:LANE]
    for t in range(1, T_POOL):
        pooled = jnp.maximum(pooled, raw[:, t * LANE:(t + 1) * LANE])

    # Fused bias + ReLU after pooling (valid: ReLU monotone, bias time-const).
    feat = jnp.maximum(pooled + fbias_ref[...], 0.0)              # (TB, 128)

    # TODO(synk): training-mode dropout (random mask + 1/(1-p) scaling) on
    # `feat` not implemented; eval-mode (identity) semantics are used here.

    out_ref[...] = (
        jnp.dot(feat, wfc_ref[...], preferred_element_type=jnp.float32)
        + bfc_ref[...])                                           # (TB, 128)


# ------------------------------ JAX wrapper ---------------------------------
def caser_forward(states, len_states, kp):
    # len_states is unused by the torch forward (masking uses the padding id).
    del len_states

    emb = jnp.take(kp["item_embeddings"], states, axis=0)         # (B, S, H)
    mask = (states != ITEM_NUM).astype(jnp.float32)[..., None]
    emb2d = (emb * mask).reshape(states.shape[0], SH)             # lane-dense (B, 256)

    b = states.shape[0]
    b8 = _round_up(b, 8)
    if b8 > MAX_BATCH_TILE:
        tb = MAX_BATCH_TILE
    elif b8 >= 16:
        tb = _round_up(b8 // 2, 8)            # >= 2 grid steps -> v7x megacore
    else:
        tb = b8
    b_pad = _round_up(b, tb)
    if b_pad != b:
        emb2d = jnp.pad(emb2d, ((0, b_pad - b), (0, 0)))

    out = pl.pallas_call(
        caser_kernel,
        out_shape=jax.ShapeDtypeStruct((b_pad, ITEM_PAD), jnp.float32),
        grid=(b_pad // tb,),
        in_specs=[
            pl.BlockSpec((tb, SH), lambda i: (i, 0)),
            # weights: constant index maps -> VMEM-resident across grid steps
            pl.BlockSpec((SH, T_POOL * LANE), lambda i: (0, 0)),
            pl.BlockSpec((FEAT_PAD, ITEM_PAD), lambda i: (0, 0)),
            pl.BlockSpec((1, FEAT_PAD), lambda i: (0, 0)),
            pl.BlockSpec((1, ITEM_PAD), lambda i: (0, 0)),
        ],
        out_specs=pl.BlockSpec((tb, ITEM_PAD), lambda i: (i, 0)),
        compiler_params=pltpu.CompilerParams(
            dimension_semantics=("parallel",)),
    )(emb2d, kp["wconv"], kp["wfc"], kp["fbias"], kp["bfc"])

    return out[:b, :ITEM_NUM]


# ------------------------- deterministic parameters -------------------------
def init_params(key):
    """Parameters in (PyTorch-like) layout, used by the reference path."""
    ks = jax.random.split(key, 6)

    # nn.Embedding(item_num + 1, hidden), normal(0, 0.01)
    item_embeddings = 0.01 * jax.random.normal(
        ks[0], (ITEM_NUM + 1, HIDDEN), jnp.float32)

    # horizontal convs: Conv2d(1, F, (fs, H)), xavier_normal weight, bias 0.1
    h_conv_w, h_conv_b = [], []
    for i, fs in enumerate(FILTER_SIZES):
        fan_in = 1 * fs * HIDDEN
        fan_out = NUM_FILTERS * fs * HIDDEN
        std = math.sqrt(2.0 / (fan_in + fan_out))
        w = std * jax.random.normal(
            jax.random.fold_in(ks[1], i),
            (NUM_FILTERS, 1, fs, HIDDEN), jnp.float32)            # torch (F,1,fs,H)
        h_conv_w.append(w)
        h_conv_b.append(jnp.full((NUM_FILTERS,), 0.1, jnp.float32))

    # vertical conv: Conv2d(1, 1, (S, 1)), xavier_normal weight, bias 0.1
    std_v = math.sqrt(2.0 / (STATE_SIZE + STATE_SIZE))
    v_conv_w = std_v * jax.random.normal(ks[2], (1, 1, STATE_SIZE, 1), jnp.float32)
    v_conv_b = jnp.full((1,), 0.1, jnp.float32)

    # s_fc: Linear(final_dim, item_num), default uniform(-1/sqrt(fan_in), ...)
    bound = 1.0 / math.sqrt(FINAL_DIM)
    fc_w = jax.random.uniform(ks[3], (ITEM_NUM, FINAL_DIM), jnp.float32,
                              -bound, bound)                      # torch (out, in)
    fc_b = jax.random.uniform(ks[4], (ITEM_NUM,), jnp.float32, -bound, bound)

    return {
        "item_embeddings": item_embeddings,
        "h_conv_w": h_conv_w, "h_conv_b": h_conv_b,
        "v_conv_w": v_conv_w, "v_conv_b": v_conv_b,
        "fc_w": fc_w, "fc_b": fc_b,
    }


def pack_params(p):
    """Host-side packing: block-Toeplitz conv weight, fused biases, padded fc."""
    # ---- packed conv weight (S*H, T_POOL*128) ------------------------------
    # time block t (128 lanes): [fs=2 filters (16) | fs=3 (16) | fs=4 (16) |
    #                            vertical (32) | zeros (48)]
    # Invalid (filter, time) slots replicate the t=0 column so the max over the
    # T_POOL blocks equals the max over that filter's valid times.
    wconv = jnp.zeros((SH, T_POOL * LANE), jnp.float32)
    lane_off = 0
    for i, fs in enumerate(FILTER_SIZES):
        w = p["h_conv_w"][i]                                      # (F, 1, fs, H)
        w2 = jnp.transpose(w[:, 0], (1, 2, 0)).reshape(fs * HIDDEN,
                                                       NUM_FILTERS)  # (fs*H, F)
        t_valid = STATE_SIZE - fs + 1
        for t in range(T_POOL):
            tt = t if t < t_valid else 0
            col = t * LANE + lane_off
            wconv = wconv.at[tt * HIDDEN:(tt + fs) * HIDDEN,
                             col:col + NUM_FILTERS].set(w2)
        lane_off += NUM_FILTERS

    # vertical conv columns: column h has vw[s] at row s*H + h (same each block)
    vker = p["v_conv_w"][0, 0, :, 0]                              # (S,)
    vcols = jnp.zeros((SH, HIDDEN), jnp.float32)
    eye_h = jnp.eye(HIDDEN, dtype=jnp.float32)
    for s in range(STATE_SIZE):
        vcols = vcols.at[s * HIDDEN:(s + 1) * HIDDEN, :].set(vker[s] * eye_h)
    for t in range(T_POOL):
        col = t * LANE + NUM_FILTERS_TOTAL
        wconv = wconv.at[:, col:col + HIDDEN].set(vcols)

    # ---- fused feature bias: [hb0 | hb1 | hb2 | vb*ones(H) | zeros(pad)] ----
    fbias = jnp.concatenate(
        [jnp.concatenate(p["h_conv_b"]),
         jnp.full((HIDDEN,), p["v_conv_b"][0], jnp.float32),
         jnp.zeros((FEAT_PAD - FINAL_DIM,), jnp.float32)]).reshape(1, FEAT_PAD)

    # ---- zero-padded fc weight / bias (lane-dense output) ------------------
    wfc = jnp.zeros((FEAT_PAD, ITEM_PAD), jnp.float32)
    wfc = wfc.at[:FINAL_DIM, :ITEM_NUM].set(p["fc_w"].T)
    bfc = jnp.zeros((1, ITEM_PAD), jnp.float32)
    bfc = bfc.at[0, :ITEM_NUM].set(p["fc_b"])

    return {
        "item_embeddings": p["item_embeddings"],
        "wconv": wconv, "wfc": wfc, "fbias": fbias, "bfc": bfc,
    }


# ------------------------- plain-JAX reference ------------------------------
def reference_forward(states, params):
    emb = jnp.take(params["item_embeddings"], states, axis=0)
    mask = (states != ITEM_NUM).astype(jnp.float32)[..., None]
    x = emb * mask                                                # (B, S, H)
    b = x.shape[0]

    pooled = []
    for i, fs in enumerate(FILTER_SIZES):
        w = params["h_conv_w"][i]                                 # (F, 1, fs, H)
        w2 = jnp.transpose(w[:, 0], (1, 2, 0)).reshape(fs * HIDDEN, NUM_FILTERS)
        outs = []
        for t in range(STATE_SIZE - fs + 1):
            win = x[:, t:t + fs, :].reshape(b, fs * HIDDEN)
            outs.append(win @ w2 + params["h_conv_b"][i][None, :])
        h = jnp.maximum(jnp.stack(outs, axis=-1), 0.0)            # (B, F, T)
        pooled.append(jnp.max(h, axis=-1))                        # (B, F)
    h_pool = jnp.concatenate(pooled, axis=1)                      # (B, 48)

    vw = params["v_conv_w"][0, 0]                                 # (S, 1)
    v = jnp.maximum(jnp.sum(x * vw[None, :, :], axis=1)
                    + params["v_conv_b"][0], 0.0)                 # (B, H)

    feat = jnp.concatenate([h_pool, v], axis=1)                   # (B, 80)
    return feat @ params["fc_w"].T + params["fc_b"][None, :]


# --------------------------------- main --------------------------------------
if __name__ == "__main__":
    key = jax.random.PRNGKey(0)
    pkey, skey = jax.random.split(key)

    params = init_params(pkey)
    kparams = pack_params(params)

    # states include some padding ids (== ITEM_NUM) to exercise the mask path
    states = jax.random.randint(skey, (BATCH, STATE_SIZE), 0, ITEM_NUM + 1,
                                dtype=jnp.int32)
    len_states = jnp.full((BATCH,), STATE_SIZE, dtype=jnp.int32)

    fwd = jax.jit(caser_forward)
    out = jax.block_until_ready(fwd(states, len_states, kparams))

    ref = jax.block_until_ready(reference_forward(states, params))
    assert out.shape == (BATCH, ITEM_NUM)
    max_err = float(jnp.max(jnp.abs(out - ref)))
    assert jnp.allclose(out, ref, atol=1e-4, rtol=1e-4), max_err

    print("KERNEL_OK")
</pallas_src>

<mosaic_0001>
module attributes {stable_mosaic.version = 11 : i64} {
  func.func @caser_kernel(%arg0: i32, %arg1: memref<8x256xf32, #tpu.memory_space<vmem>>, %arg2: memref<256x896xf32, #tpu.memory_space<vmem>>, %arg3: memref<128x128xf32, #tpu.memory_space<vmem>>, %arg4: memref<1x128xf32, #tpu.memory_space<vmem>>, %arg5: memref<1x128xf32, #tpu.memory_space<vmem>>, %arg6: memref<8x128xf32, #tpu.memory_space<vmem>>) attributes {dimension_semantics = [#tpu.dimension_semantics<parallel>], iteration_bounds = array<i64: 1>, scalar_prefetch = 0 : i64, scratch_operands = 0 : i64, tpu.core_type = #tpu.core_type<tc>, window_params = [{transform_indices = @transform_0, window_bounds = array<i64: 8, 256>}, {pipeline_mode = #tpu.pipeline_mode<synchronous>, transform_indices = @transform_1, window_bounds = array<i64: 256, 896>}, {pipeline_mode = #tpu.pipeline_mode<synchronous>, transform_indices = @transform_2, window_bounds = array<i64: 128, 128>}, {pipeline_mode = #tpu.pipeline_mode<synchronous>, transform_indices = @transform_3, window_bounds = array<i64: 1, 128>}, {pipeline_mode = #tpu.pipeline_mode<synchronous>, transform_indices = @transform_4, window_bounds = array<i64: 1, 128>}, {transform_indices = @transform_5, window_bounds = array<i64: 8, 128>}]} {
    %c0 = arith.constant 0 : index
    %c0_0 = arith.constant 0 : index
    %0 = vector.load %arg1[%c0, %c0_0] : memref<8x256xf32, #tpu.memory_space<vmem>>, vector<8x256xf32>
    %c0_1 = arith.constant 0 : index
    %c0_2 = arith.constant 0 : index
    %1 = vector.load %arg2[%c0_1, %c0_2] : memref<256x896xf32, #tpu.memory_space<vmem>>, vector<256x896xf32>
    %cst = arith.constant dense<0.000000e+00> : vector<8x896xf32>
    %2 = tpu.matmul %0, %1, %cst {dimension_numbers = #tpu.dot_dimension_numbers<[1], [0], [0], [1], [0, 0, 1, 1], [], []>} : vector<8x256xf32>, vector<256x896xf32>, vector<8x896xf32> -> vector<8x896xf32>
    %3 = vector.extract_strided_slice %2 {offsets = [0, 0], sizes = [8, 128], strides = [1, 1]} : vector<8x896xf32> to vector<8x128xf32>
    %4 = vector.extract_strided_slice %2 {offsets = [0, 128], sizes = [8, 128], strides = [1, 1]} : vector<8x896xf32> to vector<8x128xf32>
    %5 = arith.maximumf %3, %4 : vector<8x128xf32>
    %6 = vector.extract_strided_slice %2 {offsets = [0, 256], sizes = [8, 128], strides = [1, 1]} : vector<8x896xf32> to vector<8x128xf32>
    %7 = arith.maximumf %5, %6 : vector<8x128xf32>
    %8 = vector.extract_strided_slice %2 {offsets = [0, 384], sizes = [8, 128], strides = [1, 1]} : vector<8x896xf32> to vector<8x128xf32>
    %9 = arith.maximumf %7, %8 : vector<8x128xf32>
    %10 = vector.extract_strided_slice %2 {offsets = [0, 512], sizes = [8, 128], strides = [1, 1]} : vector<8x896xf32> to vector<8x128xf32>
    %11 = arith.maximumf %9, %10 : vector<8x128xf32>
    %12 = vector.extract_strided_slice %2 {offsets = [0, 640], sizes = [8, 128], strides = [1, 1]} : vector<8x896xf32> to vector<8x128xf32>
    %13 = arith.maximumf %11, %12 : vector<8x128xf32>
    %14 = vector.extract_strided_slice %2 {offsets = [0, 768], sizes = [8, 128], strides = [1, 1]} : vector<8x896xf32> to vector<8x128xf32>
    %15 = arith.maximumf %13, %14 : vector<8x128xf32>
    %c0_3 = arith.constant 0 : index
    %c0_4 = arith.constant 0 : index
    %16 = vector.load %arg4[%c0_3, %c0_4] : memref<1x128xf32, #tpu.memory_space<vmem>>, vector<1x128xf32>
    %17 = vector.broadcast %16 : vector<1x128xf32> to vector<8x128xf32>
    %18 = arith.addf %15, %17 : vector<8x128xf32>
    %cst_5 = arith.constant 0.000000e+00 : f32
    %19 = vector.broadcast %cst_5 : f32 to vector<8x128xf32>
    %20 = arith.maximumf %18, %19 : vector<8x128xf32>
    %c0_6 = arith.constant 0 : index
    %c0_7 = arith.constant 0 : index
    %21 = vector.load %arg3[%c0_6, %c0_7] : memref<128x128xf32, #tpu.memory_space<vmem>>, vector<128x128xf32>
    %cst_8 = arith.constant dense<0.000000e+00> : vector<8x128xf32>
    %22 = tpu.matmul %20, %21, %cst_8 {dimension_numbers = #tpu.dot_dimension_numbers<[1], [0], [0], [1], [0, 0, 1, 1], [], []>} : vector<8x128xf32>, vector<128x128xf32>, vector<8x128xf32> -> vector<8x128xf32>
    %c0_9 = arith.constant 0 : index
    %c0_10 = arith.constant 0 : index
    %23 = vector.load %arg5[%c0_9, %c0_10] : memref<1x128xf32, #tpu.memory_space<vmem>>, vector<1x128xf32>
    %24 = vector.broadcast %23 : vector<1x128xf32> to vector<8x128xf32>
    %25 = arith.addf %22, %24 : vector<8x128xf32>
    %c0_11 = arith.constant 0 : index
    %c0_12 = arith.constant 0 : index
    %26 = vector.load %arg6[%c0_11, %c0_12] : memref<8x128xf32, #tpu.memory_space<vmem>>, vector<8x128xf32>
    tpu.vector_store %arg6[%c0_11, %c0_12], %25 {strides = array<i32>} : memref<8x128xf32, #tpu.memory_space<vmem>>, vector<8x128xf32>,
    return
  }
  func.func @transform_0(%arg0: i32) -> (i32, i32) {
    %c0_i32 = arith.constant 0 : i32
    %c0_i32_0 = arith.constant 0 : i32
    return %arg0, %c0_i32 : i32, i32
  }
  func.func @transform_1(%arg0: i32) -> (i32, i32) {
    %c0_i32 = arith.constant 0 : i32
    %c0_i32_0 = arith.constant 0 : i32
    %c0_i32_1 = arith.constant 0 : i32
    return %c0_i32, %c0_i32_0 : i32, i32
  }
  func.func @transform_2(%arg0: i32) -> (i32, i32) {
    %c0_i32 = arith.constant 0 : i32
    %c0_i32_0 = arith.constant 0 : i32
    %c0_i32_1 = arith.constant 0 : i32
    return %c0_i32, %c0_i32_0 : i32, i32
  }
  func.func @transform_3(%arg0: i32) -> (i32, i32) {
    %c0_i32 = arith.constant 0 : i32
    %c0_i32_0 = arith.constant 0 : i32
    %c0_i32_1 = arith.constant 0 : i32
    return %c0_i32, %c0_i32_0 : i32, i32
  }
  func.func @transform_4(%arg0: i32) -> (i32, i32) {
    %c0_i32 = arith.constant 0 : i32
    %c0_i32_0 = arith.constant 0 : i32
    %c0_i32_1 = arith.constant 0 : i32
    return %c0_i32, %c0_i32_0 : i32, i32
  }
  func.func @transform_5(%arg0: i32) -> (i32, i32) {
    %c0_i32 = arith.constant 0 : i32
    %c0_i32_0 = arith.constant 0 : i32
    return %arg0, %c0_i32 : i32, i32
  }
}

</mosaic_0001>

<bundles_post_ra>
// kernel: caser_forward.1
= control target key start
LH: loop header
LB: loop body
LE: loop exit
PB: predicated region body
PF: predicated region fallthrough
CT: control target
= control target key end

     0   :  { %10 = vsyncpa [#allocation3], 0  ;;  %s773_s18 = smov [#allocation2]   ;;  %s886_s0 = inlined_call_operand.vmem [shape: f32[8,256], index: 0, kind: input, shape index: {}]   ;;  %s887_s1 = inlined_call_operand.hbm [shape: f32[256,896], index: 1, kind: input, shape index: {}]   ;;  %s888_s2 = inlined_call_operand.vmem [shape: f32[128,128], index: 2, kind: input, shape index: {}]   ;;  %s889_s3 = inlined_call_operand.vmem [shape: f32[1,128], index: 3, kind: input, shape index: {}]   ;;  %s890_s4 = inlined_call_operand.vmem [shape: f32[1,128], index: 4, kind: input, shape index: {}]   ;;  %s891_s5 = inlined_call_operand.vmem [shape: f32[8,128], index: 5, kind: output, shape index: {}]  }
   0x1   :  { %s18_s19 = sshll.u32 %s773_s18, 4  ;;  %s19_s19 = int_to_ptr.vmem [resolvable:$true] %s18_s19 }
   0x2   :  { %s759_s20 = scalar_lea.vmem %s19_s19, 28672  ;;  %p764_p1 = scmp.lt.s32.totalorder %s19_s19, %s19_s19 }
   0x3   :  { %p760_p0 = scmp.ne.s32.totalorder %s19_s19, %s759_s20  ;;  %p765_p2 = scmp.lt.s32.totalorder %s759_s20, %s759_s20 }
   0x5   :  { %p766_p3 = por %p765_p2, %p764_p1 }
   0x7   :  { %p767_p4 = pnand %p766_p3, %p760_p0 }
   0x9   :  { %770 = shalt.err (!%p767_p4)
}
   0xa   :  { %s774_s21 = smov 896   ;;  %s775_s22 = smov 56  }
   0xb   :  { %24 = dma.hbm_to_vmem [thread:$0]  %s887_s1, 28672, %s19_s19, [#allocation3], %s774_s21, %s774_s21, %s775_s22  }
   0xc   :  { %771 = dma.done.wait [#allocation3], 28672  }
   0xd   :  { %772 = vsyncadd [#allocation3], 4294938624  ;;  %v142_v0 = vld [vmem:[#allocation2 + $0x350] sm:$0xff]  ;;  %v141_v1 = vld [vmem:[#allocation2 + $0x348] sm:$0xff]  ;;  %vm777_vm0 = vmmov 0  }
   0xe   :  { %v135_v2 = vld [vmem:[#allocation2 + $0x318] sm:$0xff]  ;;  %260 = vmatprep.subr.mxu0 %v142_v0  ;;  %v134_v3 = vld [vmem:[#allocation2 + $0x310] sm:$0xff]  ;;  %v144_v4 = vld [vmem:[#allocation2 + $0x360] sm:$0xff] }
   0xf   :  { %261 = vmatpush1.msra.mxu0 %v141_v1  ;;  %v128_v5 = vld [vmem:[#allocation2 + $0x2e0] sm:$0xff]  ;;  %331 = vmatprep.subr.mxu1 %v144_v4  ;;  %v143_v6 = vld [vmem:[#allocation2 + $0x358] sm:$0xff]  ;;  %v137_v8 = vld [vmem:[#allocation2 + $0x328] sm:$0xff] }
  0x10   :  { %262 = vmatprep.subr.mxu0 %v135_v2  ;;  %v127_v7 = vld [vmem:[#allocation2 + $0x2d8] sm:$0xff]  ;;  %332 = vmatpush1.msra.mxu1 %v143_v6  ;;  %v136_v9 = vld [vmem:[#allocation2 + $0x320] sm:$0xff]  ;;  %v121_v10 = vld [vmem:[#allocation2 + $0x2a8] sm:$0xff] }
  0x11   :  { %263 = vmatpush1.msra.mxu0 %v134_v3  ;;  %333 = vmatprep.subr.mxu1 %v137_v8  ;;  %v130_v11 = vld [vmem:[#allocation2 + $0x2f0] sm:$0xff]  ;;  %v120_v12 = vld [vmem:[#allocation2 + $0x2a0] sm:$0xff]  ;;  %v129_v13 = vld [vmem:[#allocation2 + $0x2e8] sm:$0xff] }
  0x12   :  { %264 = vmatprep.subr.mxu0 %v128_v5  ;;  %334 = vmatpush1.msra.mxu1 %v136_v9  ;;  %v123_v14 = vld [vmem:[#allocation2 + $0x2b8] sm:$0xff]  ;;  %v114_v15 = vld [vmem:[#allocation2 + $0x270] sm:$0xff]  ;;  %v113_v17 = vld [vmem:[#allocation2 + $0x268] sm:$0xff] }
  0x13   :  { %265 = vmatpush1.msra.mxu0 %v127_v7  ;;  %335 = vmatprep.subr.mxu1 %v130_v11  ;;  %v122_v16 = vld [vmem:[#allocation2 + $0x2b0] sm:$0xff]  ;;  %v116_v18 = vld [vmem:[#allocation2 + $0x280] sm:$0xff]  ;;  %v107_v19 = vld [vmem:[#allocation2 + $0x238] sm:$0xff] }
  0x14   :  { %266 = vmatprep.subr.mxu0 %v121_v10  ;;  %336 = vmatpush1.msra.mxu1 %v129_v13  ;;  %v115_v20 = vld [vmem:[#allocation2 + $0x278] sm:$0xff]  ;;  %v106_v21 = vld [vmem:[#allocation2 + $0x230] sm:$0xff]  ;;  %v109_v22 = vld [vmem:[#allocation2 + $0x248] sm:$0xff] }
  0x15   :  { %267 = vmatpush1.msra.mxu0 %v120_v12  ;;  %337 = vmatprep.subr.mxu1 %v123_v14  ;;  %v100_v23 = vld [vmem:[#allocation2 + $0x200] sm:$0xff]  ;;  %v99_v25 = vld [vmem:[#allocation2 + $0x1f8] sm:$0xff]  ;;  %v102_v26 = vld [vmem:[#allocation2 + $0x210] sm:$0xff] }
  0x16   :  { %268 = vmatprep.subr.mxu0 %v114_v15  ;;  %338 = vmatpush1.msra.mxu1 %v122_v16  ;;  %v108_v24 = vld [vmem:[#allocation2 + $0x240] sm:$0xff]  ;;  %v93_v27 = vld [vmem:[#allocation2 + $0x1c8] sm:$0xff]  ;;  %v95_v30 = vld [vmem:[#allocation2 + $0x1d8] sm:$0xff] }
  0x17   :  { %269 = vmatpush1.msra.mxu0 %v113_v17  ;;  %339 = vmatprep.subr.mxu1 %v116_v18  ;;  %v101_v28 = vld [vmem:[#allocation2 + $0x208] sm:$0xff]  ;;  %v92_v29 = vld [vmem:[#allocation2 + $0x1c0] sm:$0xff]  ;;  %v86_v31 = vld [vmem:[#allocation2 + $0x190] sm:$0xff] }
  0x18   :  { %270 = vmatprep.subr.mxu0 %v107_v19  ;;  %340 = vmatpush1.msra.mxu1 %v115_v20  ;;  %v94_v32 = vld [vmem:[#allocation2 + $0x1d0] sm:$0xff]  ;;  %v85_v33 = vld [vmem:[#allocation2 + $0x188] sm:$0xff]  ;;  %v88_v34 = vld [vmem:[#allocation2 + $0x1a0] sm:$0xff] }
  0x19   :  { %271 = vmatpush1.msra.mxu0 %v106_v21  ;;  %341 = vmatprep.subr.mxu1 %v109_v22  ;;  %v79_v35 = vld [vmem:[#allocation2 + $0x158] sm:$0xff]  ;;  %v78_v37 = vld [vmem:[#allocation2 + $0x150] sm:$0xff]  ;;  %v81_v38 = vld [vmem:[#allocation2 + $0x168] sm:$0xff] }
  0x1a   :  { %272 = vmatprep.subr.mxu0 %v100_v23  ;;  %342 = vmatpush1.msra.mxu1 %v108_v24  ;;  %v87_v36 = vld [vmem:[#allocation2 + $0x198] sm:$0xff]  ;;  %v72_v39 = vld [vmem:[#allocation2 + $0x120] sm:$0xff]  ;;  %v74_v42 = vld [vmem:[#allocation2 + $0x130] sm:$0xff] }
  0x1b   :  { %273 = vmatpush1.msra.mxu0 %v99_v25  ;;  %343 = vmatprep.subr.mxu1 %v102_v26  ;;  %v80_v40 = vld [vmem:[#allocation2 + $0x160] sm:$0xff]  ;;  %v71_v41 = vld [vmem:[#allocation2 + $0x118] sm:$0xff]  ;;  %v65_v43 = vld [vmem:[#allocation2 + $0xe8] sm:$0xff] }
  0x1c   :  { %274 = vmatprep.subr.mxu0 %v93_v27  ;;  %344 = vmatpush1.msra.mxu1 %v101_v28  ;;  %v73_v44 = vld [vmem:[#allocation2 + $0x128] sm:$0xff]  ;;  %v64_v45 = vld [vmem:[#allocation2 + $0xe0] sm:$0xff]  ;;  %v67_v46 = vld [vmem:[#allocation2 + $0xf8] sm:$0xff] }
  0x1d   :  { %275 = vmatpush1.msra.mxu0 %v92_v29  ;;  %345 = vmatprep.subr.mxu1 %v95_v30  ;;  %v58_v47 = vld [vmem:[#allocation2 + $0xb0] sm:$0xff]  ;;  %v57_v49 = vld [vmem:[#allocation2 + $0xa8] sm:$0xff]  ;;  %v60_v50 = vld [vmem:[#allocation2 + $0xc0] sm:$0xff] }
  0x1e   :  { %276 = vmatprep.subr.mxu0 %v86_v31  ;;  %346 = vmatpush1.msra.mxu1 %v94_v32  ;;  %v66_v48 = vld [vmem:[#allocation2 + $0xf0] sm:$0xff]  ;;  %v51_v51 = vld [vmem:[#allocation2 + $0x78] sm:$0xff]  ;;  %v53_v54 = vld [vmem:[#allocation2 + $0x88] sm:$0xff] }
  0x1f   :  { %277 = vmatpush1.msra.mxu0 %v85_v33  ;;  %347 = vmatprep.subr.mxu1 %v88_v34  ;;  %v59_v52 = vld [vmem:[#allocation2 + $0xb8] sm:$0xff]  ;;  %v50_v53 = vld [vmem:[#allocation2 + $0x70] sm:$0xff]  ;;  %v44_v55 = vld [vmem:[#allocation2 + $0x40] sm:$0xff] }
  0x20   :  { %278 = vmatprep.subr.mxu0 %v79_v35  ;;  %348 = vmatpush1.msra.mxu1 %v87_v36  ;;  %v52_v56 = vld [vmem:[#allocation2 + $0x80] sm:$0xff]  ;;  %v43_v57 = vld [vmem:[#allocation2 + $0x38] sm:$0xff]  ;;  %v46_v58 = vld [vmem:[#allocation2 + $0x50] sm:$0xff] }
  0x21   :  { %279 = vmatpush1.msra.mxu0 %v78_v37  ;;  %349 = vmatprep.subr.mxu1 %v81_v38  ;;  %v37_v59 = vld [vmem:[#allocation2 + $0x8] sm:$0xff]  ;;  %v36_v61 = vld [vmem:[#allocation2] sm:$0xff]  ;;  %v39_v62 = vld [vmem:[#allocation2 + $0x18] sm:$0xff] }
  0x22   :  { %280 = vmatprep.subr.mxu0 %v72_v39  ;;  %350 = vmatpush1.msra.mxu1 %v80_v40  ;;  %v45_v60 = vld [vmem:[#allocation2 + $0x48] sm:$0xff]  ;;  %v254_v63 = vld [vmem:[#allocation2 + $0x6d0] sm:$0xff]  ;;  %v256_v2 = vld [vmem:[#allocation2 + $0x6e0] sm:$0xff] }
  0x23   :  { %281 = vmatpush1.msra.mxu0 %v71_v41  ;;  %351 = vmatprep.subr.mxu1 %v74_v42  ;;  %v38_v0 = vld [vmem:[#allocation2 + $0x10] sm:$0xff]  ;;  %v253_v1 = vld [vmem:[#allocation2 + $0x6c8] sm:$0xff]  ;;  %v247_v3 = vld [vmem:[#allocation2 + $0x698] sm:$0xff] }
  0x24   :  { %282 = vmatprep.subr.mxu0 %v65_v43  ;;  %352 = vmatpush1.msra.mxu1 %v73_v44  ;;  %v255_v4 = vld [vmem:[#allocation2 + $0x6d8] sm:$0xff]  ;;  %v246_v5 = vld [vmem:[#allocation2 + $0x690] sm:$0xff]  ;;  %v249_v6 = vld [vmem:[#allocation2 + $0x6a8] sm:$0xff] }
  0x25   :  { %283 = vmatpush1.msra.mxu0 %v64_v45  ;;  %353 = vmatprep.subr.mxu1 %v67_v46  ;;  %v240_v7 = vld [vmem:[#allocation2 + $0x660] sm:$0xff]  ;;  %v239_v9 = vld [vmem:[#allocation2 + $0x658] sm:$0xff]  ;;  %v242_v10 = vld [vmem:[#allocation2 + $0x670] sm:$0xff] }
  0x26   :  { %284 = vmatprep.subr.mxu0 %v58_v47  ;;  %354 = vmatpush1.msra.mxu1 %v66_v48  ;;  %v248_v8 = vld [vmem:[#allocation2 + $0x6a0] sm:$0xff]  ;;  %v233_v11 = vld [vmem:[#allocation2 + $0x628] sm:$0xff]  ;;  %v235_v14 = vld [vmem:[#allocation2 + $0x638] sm:$0xff] }
  0x27   :  { %285 = vmatpush1.msra.mxu0 %v57_v49  ;;  %355 = vmatprep.subr.mxu1 %v60_v50  ;;  %v241_v12 = vld [vmem:[#allocation2 + $0x668] sm:$0xff]  ;;  %v232_v13 = vld [vmem:[#allocation2 + $0x620] sm:$0xff]  ;;  %v226_v15 = vld [vmem:[#allocation2 + $0x5f0] sm:$0xff] }
  0x28   :  { %286 = vmatprep.subr.mxu0 %v51_v51  ;;  %356 = vmatpush1.msra.mxu1 %v59_v52  ;;  %v234_v16 = vld [vmem:[#allocation2 + $0x630] sm:$0xff]  ;;  %v225_v17 = vld [vmem:[#allocation2 + $0x5e8] sm:$0xff]  ;;  %v228_v18 = vld [vmem:[#allocation2 + $0x600] sm:$0xff] }
  0x29   :  { %287 = vmatpush1.msra.mxu0 %v50_v53  ;;  %357 = vmatprep.subr.mxu1 %v53_v54  ;;  %v219_v19 = vld [vmem:[#allocation2 + $0x5b8] sm:$0xff]  ;;  %v218_v21 = vld [vmem:[#allocation2 + $0x5b0] sm:$0xff]  ;;  %v221_v22 = vld [vmem:[#allocation2 + $0x5c8] sm:$0xff] }
  0x2a   :  { %288 = vmatprep.subr.mxu0 %v44_v55  ;;  %358 = vmatpush1.msra.mxu1 %v52_v56  ;;  %v227_v20 = vld [vmem:[#allocation2 + $0x5f8] sm:$0xff]  ;;  %v212_v23 = vld [vmem:[#allocation2 + $0x580] sm:$0xff]  ;;  %v214_v26 = vld [vmem:[#allocation2 + $0x590] sm:$0xff] }
  0x2b   :  { %289 = vmatpush1.msra.mxu0 %v43_v57  ;;  %359 = vmatprep.subr.mxu1 %v46_v58  ;;  %v220_v24 = vld [vmem:[#allocation2 + $0x5c0] sm:$0xff]  ;;  %v211_v25 = vld [vmem:[#allocation2 + $0x578] sm:$0xff]  ;;  %v205_v27 = vld [vmem:[#allocation2 + $0x548] sm:$0xff] }
  0x2c   :  { %290 = vmatprep.subr.mxu0 %v37_v59  ;;  %360 = vmatpush1.msra.mxu1 %v45_v60  ;;  %v213_v28 = vld [vmem:[#allocation2 + $0x588] sm:$0xff]  ;;  %v204_v29 = vld [vmem:[#allocation2 + $0x540] sm:$0xff]  ;;  %v207_v30 = vld [vmem:[#allocation2 + $0x558] sm:$0xff] }
  0x2d   :  { %291 = vmatpush1.msra.mxu0 %v36_v61  ;;  %361 = vmatprep.subr.mxu1 %v39_v62  ;;  %v198_v31 = vld [vmem:[#allocation2 + $0x510] sm:$0xff]  ;;  %v197_v33 = vld [vmem:[#allocation2 + $0x508] sm:$0xff]  ;;  %v200_v34 = vld [vmem:[#allocation2 + $0x520] sm:$0xff] }
  0x2e   :  { %292 = vmatprep.subr.mxu0 %v254_v63  ;;  %362 = vmatpush1.msra.mxu1 %v38_v0  ;;  %v206_v32 = vld [vmem:[#allocation2 + $0x550] sm:$0xff]  ;;  %v191_v35 = vld [vmem:[#allocation2 + $0x4d8] sm:$0xff]  ;;  %v193_v38 = vld [vmem:[#allocation2 + $0x4e8] sm:$0xff] }
  0x2f   :  { %293 = vmatpush2.msra.mxu0 %v253_v1  ;;  %363 = vmatprep.subr.mxu1 %v256_v2  ;;  %v199_v36 = vld [vmem:[#allocation2 + $0x518] sm:$0xff]  ;;  %v190_v37 = vld [vmem:[#allocation2 + $0x4d0] sm:$0xff]  ;;  %v184_v39 = vld [vmem:[#allocation2 + $0x4a0] sm:$0xff] }
  0x30   :  { %294 = vmatprep.subr.mxu0 %v247_v3  ;;  %364 = vmatpush2.msra.mxu1 %v255_v4  ;;  %v192_v40 = vld [vmem:[#allocation2 + $0x4e0] sm:$0xff]  ;;  %v183_v41 = vld [vmem:[#allocation2 + $0x498] sm:$0xff]  ;;  %v186_v42 = vld [vmem:[#allocation2 + $0x4b0] sm:$0xff] }
  0x31   :  { %295 = vmatpush2.msra.mxu0 %v246_v5  ;;  %365 = vmatprep.subr.mxu1 %v249_v6  ;;  %v177_v43 = vld [vmem:[#allocation2 + $0x468] sm:$0xff]  ;;  %v176_v45 = vld [vmem:[#allocation2 + $0x460] sm:$0xff]  ;;  %v179_v46 = vld [vmem:[#allocation2 + $0x478] sm:$0xff] }
  0x32   :  { %296 = vmatprep.subr.mxu0 %v240_v7  ;;  %366 = vmatpush2.msra.mxu1 %v248_v8  ;;  %v185_v44 = vld [vmem:[#allocation2 + $0x4a8] sm:$0xff]  ;;  %v170_v47 = vld [vmem:[#allocation2 + $0x430] sm:$0xff]  ;;  %v172_v50 = vld [vmem:[#allocation2 + $0x440] sm:$0xff] }
  0x33   :  { %297 = vmatpush2.msra.mxu0 %v239_v9  ;;  %367 = vmatprep.subr.mxu1 %v242_v10  ;;  %v178_v48 = vld [vmem:[#allocation2 + $0x470] sm:$0xff]  ;;  %v169_v49 = vld [vmem:[#allocation2 + $0x428] sm:$0xff]  ;;  %v163_v51 = vld [vmem:[#allocation2 + $0x3f8] sm:$0xff] }
  0x34   :  { %298 = vmatprep.subr.mxu0 %v233_v11  ;;  %368 = vmatpush2.msra.mxu1 %v241_v12  ;;  %v171_v52 = vld [vmem:[#allocation2 + $0x438] sm:$0xff]  ;;  %v162_v53 = vld [vmem:[#allocation2 + $0x3f0] sm:$0xff]  ;;  %v165_v54 = vld [vmem:[#allocation2 + $0x408] sm:$0xff] }
  0x35   :  { %299 = vmatpush2.msra.mxu0 %v232_v13  ;;  %369 = vmatprep.subr.mxu1 %v235_v14  ;;  %v156_v55 = vld [vmem:[#allocation2 + $0x3c0] sm:$0xff]  ;;  %v814_v56 = vld [vmem:[%s886_s0 + $0x8] sm:$0xff]  ;;  %v155_v57 = vld [vmem:[#allocation2 + $0x3b8] sm:$0xff] }
  0x36   :  { %300 = vmatprep.subr.mxu0 %v226_v15  ;;  %370 = vmatpush2.msra.mxu1 %v234_v16  ;;  %v164_v58 = vld [vmem:[#allocation2 + $0x400] sm:$0xff]  ;;  %v149_v59 = vld [vmem:[#allocation2 + $0x388] sm:$0xff]  ;;  %v158_v60 = vld [vmem:[#allocation2 + $0x3d0] sm:$0xff] }
  0x37   :  { %301 = vmatpush2.msra.mxu0 %v225_v17  ;;  %371 = vmatprep.subr.mxu1 %v228_v18  ;;  %v148_v61 = vld [vmem:[#allocation2 + $0x380] sm:$0xff]  ;;  %v157_v62 = vld [vmem:[#allocation2 + $0x3c8] sm:$0xff]  ;;  %v146_v0 = vld [vmem:[#allocation2 + $0x370] sm:$0xff] }
  0x38   :  { %302 = vmatprep.subr.mxu0 %v219_v19  ;;  %372 = vmatpush2.msra.mxu1 %v227_v20  ;;  %v820_v63 = vld [vmem:[%s886_s0] sm:$0xff]  ;;  %v145_v1 = vld [vmem:[#allocation2 + $0x368] sm:$0xff]  ;;  %v151_v2 = vld [vmem:[#allocation2 + $0x398] sm:$0xff] }
  0x39   :  { %303 = vmatpush2.msra.mxu0 %v218_v21  ;;  %373 = vmatprep.subr.mxu1 %v221_v22  ;;  %v139_v3 = vld [vmem:[#allocation2 + $0x338] sm:$0xff]  ;;  %v150_v4 = vld [vmem:[#allocation2 + $0x390] sm:$0xff]  ;;  %v132_v6 = vld [vmem:[#allocation2 + $0x300] sm:$0xff] }
  0x3a   :  { %304 = vmatprep.subr.mxu0 %v212_v23  ;;  %374 = vmatpush2.msra.mxu1 %v220_v24  ;;  %v138_v5 = vld [vmem:[#allocation2 + $0x330] sm:$0xff]  ;;  %v131_v7 = vld [vmem:[#allocation2 + $0x2f8] sm:$0xff]  ;;  %v125_v9 = vld [vmem:[#allocation2 + $0x2c8] sm:$0xff] }
  0x3b   :  { %305 = vmatpush2.msra.mxu0 %v211_v25  ;;  %375 = vmatprep.subr.mxu1 %v214_v26  ;;  %v259_v8 = vld [vmem:[#allocation2 + $0x6f8] sm:$0xff]  ;;  %v124_v11 = vld [vmem:[#allocation2 + $0x2c0] sm:$0xff]  ;;  %v118_v13 = vld [vmem:[#allocation2 + $0x290] sm:$0xff] }
  0x3c   :  { %306 = vmatprep.subr.mxu0 %v205_v27  ;;  %376 = vmatpush2.msra.mxu1 %v213_v28  ;;  %v147_v10 = vld [vmem:[#allocation2 + $0x378] sm:$0xff]  ;;  %v252_v12 = vld [vmem:[#allocation2 + $0x6c0] sm:$0xff]  ;;  %v117_v15 = vld [vmem:[#allocation2 + $0x288] sm:$0xff] }
  0x3d   :  { %307 = vmatpush2.msra.mxu0 %v204_v29  ;;  %377 = vmatprep.subr.mxu1 %v207_v30  ;;  %v140_v14 = vld [vmem:[#allocation2 + $0x340] sm:$0xff]  ;;  %v245_v16 = vld [vmem:[#allocation2 + $0x688] sm:$0xff]  ;;  %v111_v17 = vld [vmem:[#allocation2 + $0x258] sm:$0xff] }
  0x3e   :  { %308 = vmatprep.subr.mxu0 %v198_v31  ;;  %378 = vmatpush2.msra.mxu1 %v206_v32  ;;  %v133_v18 = vld [vmem:[#allocation2 + $0x308] sm:$0xff]  ;;  %v110_v19 = vld [vmem:[#allocation2 + $0x250] sm:$0xff]  ;;  %v104_v21 = vld [vmem:[#allocation2 + $0x220] sm:$0xff] }
  0x3f   :  { %309 = vmatpush2.msra.mxu0 %v197_v33  ;;  %379 = vmatprep.subr.mxu1 %v200_v34  ;;  %v238_v20 = vld [vmem:[#allocation2 + $0x650] sm:$0xff]  ;;  %v103_v23 = vld [vmem:[#allocation2 + $0x218] sm:$0xff]  ;;  %v97_v25 = vld [vmem:[#allocation2 + $0x1e8] sm:$0xff] }
  0x40   :  { %310 = vmatprep.subr.mxu0 %v191_v35  ;;  %380 = vmatpush2.msra.mxu1 %v199_v36  ;;  %v126_v22 = vld [vmem:[#allocation2 + $0x2d0] sm:$0xff]  ;;  %v231_v24 = vld [vmem:[#allocation2 + $0x618] sm:$0xff]  ;;  %v96_v27 = vld [vmem:[#allocation2 + $0x1e0] sm:$0xff] }
  0x41   :  { %311 = vmatpush2.msra.mxu0 %v190_v37  ;;  %381 = vmatprep.subr.mxu1 %v193_v38  ;;  %v119_v26 = vld [vmem:[#allocation2 + $0x298] sm:$0xff]  ;;  %v224_v28 = vld [vmem:[#allocation2 + $0x5e0] sm:$0xff]  ;;  %v90_v29 = vld [vmem:[#allocation2 + $0x1b0] sm:$0xff] }
  0x42   :  { %312 = vmatprep.subr.mxu0 %v184_v39  ;;  %382 = vmatpush2.msra.mxu1 %v192_v40  ;;  %v112_v30 = vld [vmem:[#allocation2 + $0x260] sm:$0xff]  ;;  %v89_v31 = vld [vmem:[#allocation2 + $0x1a8] sm:$0xff]  ;;  %v83_v33 = vld [vmem:[#allocation2 + $0x178] sm:$0xff] }
  0x43   :  { %313 = vmatpush2.msra.mxu0 %v183_v41  ;;  %383 = vmatprep.subr.mxu1 %v186_v42  ;;  %v217_v32 = vld [vmem:[#allocation2 + $0x5a8] sm:$0xff]  ;;  %v82_v35 = vld [vmem:[#allocation2 + $0x170] sm:$0xff]  ;;  %v76_v37 = vld [vmem:[#allocation2 + $0x140] sm:$0xff] }
  0x44   :  { %314 = vmatprep.subr.mxu0 %v177_v43  ;;  %384 = vmatpush2.msra.mxu1 %v185_v44  ;;  %v105_v34 = vld [vmem:[#allocation2 + $0x228] sm:$0xff]  ;;  %v210_v36 = vld [vmem:[#allocation2 + $0x570] sm:$0xff]  ;;  %v75_v39 = vld [vmem:[#allocation2 + $0x138] sm:$0xff] }
  0x45   :  { %315 = vmatpush2.msra.mxu0 %v176_v45  ;;  %385 = vmatprep.subr.mxu1 %v179_v46  ;;  %v98_v38 = vld [vmem:[#allocation2 + $0x1f0] sm:$0xff]  ;;  %v203_v40 = vld [vmem:[#allocation2 + $0x538] sm:$0xff]  ;;  %v69_v41 = vld [vmem:[#allocation2 + $0x108] sm:$0xff] }
  0x46   :  { %316 = vmatprep.subr.mxu0 %v170_v47  ;;  %386 = vmatpush2.msra.mxu1 %v178_v48  ;;  %v91_v42 = vld [vmem:[#allocation2 + $0x1b8] sm:$0xff]  ;;  %v68_v43 = vld [vmem:[#allocation2 + $0x100] sm:$0xff]  ;;  %v62_v45 = vld [vmem:[#allocation2 + $0xd0] sm:$0xff] }
  0x47   :  { %317 = vmatpush2.msra.mxu0 %v169_v49  ;;  %387 = vmatprep.subr.mxu1 %v172_v50  ;;  %v196_v44 = vld [vmem:[#allocation2 + $0x500] sm:$0xff]  ;;  %v61_v47 = vld [vmem:[#allocation2 + $0xc8] sm:$0xff]  ;;  %v55_v49 = vld [vmem:[#allocation2 + $0x98] sm:$0xff] }
  0x48   :  { %318 = vmatprep.subr.mxu0 %v163_v51  ;;  %388 = vmatpush2.msra.mxu1 %v171_v52  ;;  %v84_v46 = vld [vmem:[#allocation2 + $0x180] sm:$0xff]  ;;  %v189_v48 = vld [vmem:[#allocation2 + $0x4c8] sm:$0xff]  ;;  %v54_v51 = vld [vmem:[#allocation2 + $0x90] sm:$0xff] }
  0x49   :  { %319 = vmatpush2.msra.mxu0 %v162_v53  ;;  %389 = vmatprep.subr.mxu1 %v165_v54  ;;  %v77_v50 = vld [vmem:[#allocation2 + $0x148] sm:$0xff]  ;;  %v182_v52 = vld [vmem:[#allocation2 + $0x490] sm:$0xff]  ;;  %v48_v53 = vld [vmem:[#allocation2 + $0x60] sm:$0xff] }
  0x4a   :  { %320 = vmatprep.subr.mxu0 %v156_v55  ;;  %324 = vmatprep.mubr.f32.mxu0 %v814_v56  ;;  %v70_v54 = vld [vmem:[#allocation2 + $0x110] sm:$0xff]  ;;  %v47_v55 = vld [vmem:[#allocation2 + $0x58] sm:$0xff] }
  0x4b   :  { %321 = vmatpush2.msra.mxu0 %v155_v57  ;;  %390 = vmatpush2.msra.mxu1 %v164_v58  ;;  %v175_v57 = vld [vmem:[#allocation2 + $0x458] sm:$0xff]  ;;  %v41_v58 = vld [vmem:[#allocation2 + $0x28] sm:$0xff] }
  0x4c   :  { %322 = vmatprep.subr.mxu0 %v149_v59  ;;  %391 = vmatprep.subr.mxu1 %v158_v60  ;;  %v63_v59 = vld [vmem:[#allocation2 + $0xd8] sm:$0xff]  ;;  %v40_v60 = vld [vmem:[#allocation2 + $0x20] sm:$0xff] }
  0x4d   :  { %323 = vmatpush2.msra.mxu0 %v148_v61  ;;  %392 = vmatpush2.msra.mxu1 %v157_v62  ;;  %v168_v61 = vld [vmem:[#allocation2 + $0x420] sm:$0xff]  ;;  %v258_v62 = vld [vmem:[#allocation2 + $0x6f0] sm:$0xff] }
  0x4e   :  { %325 = vmatmul.mubr.f32.vlgmr.msra.gmra.mxu0 %v820_v63  ;;  %402 = vmatprep.subr.mxu0 %v146_v0  ;;  %v56_v0 = vld [vmem:[#allocation2 + $0xa0] sm:$0xff] }
  0x4f   :  { %403 = vmatpush1.msra.mxu0 %v145_v1  ;;  %393 = vmatprep.subr.mxu1 %v151_v2  ;;  %v257_v1 = vld [vmem:[#allocation2 + $0x6e8] sm:$0xff] }
  0x50   :  { %404 = vmatprep.subr.mxu0 %v139_v3  ;;  %394 = vmatpush2.msra.mxu1 %v150_v4  ;;  %v161_v2 = vld [vmem:[#allocation2 + $0x3e8] sm:$0xff]  ;;  %v251_v3 = vld [vmem:[#allocation2 + $0x6b8] sm:$0xff] }
  0x51   :  { %395 = vmatprep.mubr.f32.mxu1 %v814_v56  ;;  %405 = vmatpush1.msra.mxu0 %v138_v5  ;;  %v49_v4 = vld [vmem:[#allocation2 + $0x68] sm:$0xff]  ;;  %v250_v5 = vld [vmem:[#allocation2 + $0x6b0] sm:$0xff] }
  0x52   :  { %396 = vmatmul.mubr.f32.vlgmr.msra.gmra.mxu1 %v820_v63  ;;  %406 = vmatprep.subr.mxu0 %v132_v6  ;;  %v154_v6 = vld [vmem:[#allocation2 + $0x3b0] sm:$0xff] }
  0x53   :  { %407 = vmatpush1.msra.mxu0 %v131_v7  ;;  %659 = vmatprep.subr.mxu1 %v259_v8  ;;  %v244_v7 = vld [vmem:[#allocation2 + $0x680] sm:$0xff]  ;;  %v42_v8 = vld [vmem:[#allocation2 + $0x30] sm:$0xff] }
  0x54   :  { %408 = vmatprep.subr.mxu0 %v125_v9  ;;  %660 = vmatpush3.msra.mxu1 %v147_v10  ;;  %v243_v9 = vld [vmem:[#allocation2 + $0x678] sm:$0xff]  ;;  %v237_v10 = vld [vmem:[#allocation2 + $0x648] sm:$0xff] }
  0x55   :  { %409 = vmatpush1.msra.mxu0 %v124_v11  ;;  %661 = vmatprep.subr.mxu1 %v252_v12  ;;  %v236_v11 = vld [vmem:[#allocation2 + $0x640] sm:$0xff]  ;;  %v230_v12 = vld [vmem:[#allocation2 + $0x610] sm:$0xff] }
  0x56   :  { %410 = vmatprep.subr.mxu0 %v118_v13  ;;  %662 = vmatpush3.msra.mxu1 %v140_v14  ;;  %v229_v13 = vld [vmem:[#allocation2 + $0x608] sm:$0xff]  ;;  %v223_v14 = vld [vmem:[#allocation2 + $0x5d8] sm:$0xff] }
  0x57   :  { %411 = vmatpush1.msra.mxu0 %v117_v15  ;;  %663 = vmatprep.subr.mxu1 %v245_v16  ;;  %v222_v15 = vld [vmem:[#allocation2 + $0x5d0] sm:$0xff]  ;;  %v216_v16 = vld [vmem:[#allocation2 + $0x5a0] sm:$0xff] }
  0x58   :  { %412 = vmatprep.subr.mxu0 %v111_v17  ;;  %664 = vmatpush3.msra.mxu1 %v133_v18  ;;  %v215_v17 = vld [vmem:[#allocation2 + $0x598] sm:$0xff]  ;;  %v209_v18 = vld [vmem:[#allocation2 + $0x568] sm:$0xff] }
  0x59   :  { %413 = vmatpush1.msra.mxu0 %v110_v19  ;;  %665 = vmatprep.subr.mxu1 %v238_v20  ;;  %v208_v19 = vld [vmem:[#allocation2 + $0x560] sm:$0xff]  ;;  %v202_v20 = vld [vmem:[#allocation2 + $0x530] sm:$0xff] }
  0x5a   :  { %414 = vmatprep.subr.mxu0 %v104_v21  ;;  %666 = vmatpush3.msra.mxu1 %v126_v22  ;;  %v201_v21 = vld [vmem:[#allocation2 + $0x528] sm:$0xff]  ;;  %v195_v22 = vld [vmem:[#allocation2 + $0x4f8] sm:$0xff] }
  0x5b   :  { %415 = vmatpush1.msra.mxu0 %v103_v23  ;;  %667 = vmatprep.subr.mxu1 %v231_v24  ;;  %v194_v23 = vld [vmem:[#allocation2 + $0x4f0] sm:$0xff]  ;;  %v187_v24 = vld [vmem:[#allocation2 + $0x4b8] sm:$0xff] }
  0x5c   :  { %416 = vmatprep.subr.mxu0 %v97_v25  ;;  %668 = vmatpush3.msra.mxu1 %v119_v26  ;;  %v181_v25 = vld [vmem:[#allocation2 + $0x488] sm:$0xff]  ;;  %v180_v26 = vld [vmem:[#allocation2 + $0x480] sm:$0xff] }
  0x5d   :  { %417 = vmatpush1.msra.mxu0 %v96_v27  ;;  %669 = vmatprep.subr.mxu1 %v224_v28  ;;  %v174_v27 = vld [vmem:[#allocation2 + $0x450] sm:$0xff]  ;;  %v173_v28 = vld [vmem:[#allocation2 + $0x448] sm:$0xff] }
  0x5e   :  { %418 = vmatprep.subr.mxu0 %v90_v29  ;;  %670 = vmatpush3.msra.mxu1 %v112_v30  ;;  %v167_v29 = vld [vmem:[#allocation2 + $0x418] sm:$0xff]  ;;  %v166_v30 = vld [vmem:[#allocation2 + $0x410] sm:$0xff] }
  0x5f   :  { %419 = vmatpush1.msra.mxu0 %v89_v31  ;;  %671 = vmatprep.subr.mxu1 %v217_v32  ;;  %v160_v31 = vld [vmem:[#allocation2 + $0x3e0] sm:$0xff]  ;;  %v159_v32 = vld [vmem:[#allocation2 + $0x3d8] sm:$0xff] }
  0x60   :  { %420 = vmatprep.subr.mxu0 %v83_v33  ;;  %672 = vmatpush3.msra.mxu1 %v105_v34  ;;  %v153_v33 = vld [vmem:[#allocation2 + $0x3a8] sm:$0xff]  ;;  %v152_v34 = vld [vmem:[#allocation2 + $0x3a0] sm:$0xff] }
  0x61   :  { %421 = vmatpush1.msra.mxu0 %v82_v35  ;;  %673 = vmatprep.subr.mxu1 %v210_v36  ;;  %v573_v35 = vld [vmem:[%s888_s2 + $0x78] sm:$0xff]  ;;  %v776_v36 = vmov 0.0  }
  0x62   :  { %422 = vmatprep.subr.mxu0 %v76_v37  ;;  %674 = vmatpush3.msra.mxu1 %v98_v38  ;;  %v572_v37 = vld [vmem:[%s888_s2 + $0x70] sm:$0xff]  ;;  %v571_v38 = vld [vmem:[%s888_s2 + $0x68] sm:$0xff] }
  0x63   :  { %423 = vmatpush1.msra.mxu0 %v75_v39  ;;  %675 = vmatprep.subr.mxu1 %v203_v40  ;;  %v569_v39 = vld [vmem:[%s888_s2 + $0x58] sm:$0xff]  ;;  %v568_v40 = vld [vmem:[%s888_s2 + $0x50] sm:$0xff] }
  0x64   :  { %424 = vmatprep.subr.mxu0 %v69_v41  ;;  %676 = vmatpush3.msra.mxu1 %v91_v42  ;;  %v567_v41 = vld [vmem:[%s888_s2 + $0x48] sm:$0xff]  ;;  %v566_v42 = vld [vmem:[%s888_s2 + $0x40] sm:$0xff] }
  0x65   :  { %425 = vmatpush1.msra.mxu0 %v68_v43  ;;  %677 = vmatprep.subr.mxu1 %v196_v44  ;;  %v565_v43 = vld [vmem:[%s888_s2 + $0x38] sm:$0xff]  ;;  %v564_v44 = vld [vmem:[%s888_s2 + $0x30] sm:$0xff] }
  0x66   :  { %426 = vmatprep.subr.mxu0 %v62_v45  ;;  %678 = vmatpush3.msra.mxu1 %v84_v46  ;;  %v563_v45 = vld [vmem:[%s888_s2 + $0x28] sm:$0xff]  ;;  %v562_v46 = vld [vmem:[%s888_s2 + $0x20] sm:$0xff] }
  0x67   :  { %427 = vmatpush1.msra.mxu0 %v61_v47  ;;  %679 = vmatprep.subr.mxu1 %v189_v48  ;;  %v561_v47 = vld [vmem:[%s888_s2 + $0x18] sm:$0xff]  ;;  %v560_v48 = vld [vmem:[%s888_s2 + $0x10] sm:$0xff] }
  0x68   :  { %428 = vmatprep.subr.mxu0 %v55_v49  ;;  %680 = vmatpush3.msra.mxu1 %v77_v50  ;;  %v559_v49 = vld [vmem:[%s888_s2 + $0x8] sm:$0xff]  ;;  %v558_v50 = vld [vmem:[%s888_s2] sm:$0xff] }
  0x69   :  { %429 = vmatpush1.msra.mxu0 %v54_v51  ;;  %681 = vmatprep.subr.mxu1 %v182_v52 }
  0x6a   :  { %430 = vmatprep.subr.mxu0 %v48_v53  ;;  %682 = vmatpush3.msra.mxu1 %v70_v54 }
  0x6b   :  { %431 = vmatpush1.msra.mxu0 %v47_v55  ;;  %683 = vmatprep.subr.mxu1 %v175_v57 }
  0x6c   :  { %432 = vmatprep.subr.mxu0 %v41_v58  ;;  %684 = vmatpush3.msra.mxu1 %v63_v59 }
  0x6d   :  { %433 = vmatpush1.msra.mxu0 %v40_v60  ;;  %685 = vmatprep.subr.mxu1 %v168_v61 }
  0x6e   :  { %434 = vmatprep.subr.mxu0 %v258_v62  ;;  %686 = vmatpush3.msra.mxu1 %v56_v0 }
  0x6f   :  { %435 = vmatpush2.msra.mxu0 %v257_v1  ;;  %687 = vmatprep.subr.mxu1 %v161_v2 }
  0x70   :  { %436 = vmatprep.subr.mxu0 %v251_v3  ;;  %688 = vmatpush3.msra.mxu1 %v49_v4  ;;  %v657_v3 = vld [vmem:[%s889_s3] ss:$0 sm:$0xff] }
  0x71   :  { %437 = vmatpush2.msra.mxu0 %v250_v5  ;;  %689 = vmatprep.subr.mxu1 %v154_v6 }
  0x72   :  { %438 = vmatprep.subr.mxu0 %v244_v7  ;;  %690 = vmatpush3.msra.mxu1 %v42_v8  ;;  %v658_v7 = vld [vmem:[%s890_s4] ss:$0 sm:$0xff] }
  0x73   :  { %439 = vmatpush2.msra.mxu0 %v243_v9  ;;  %537 = vmatprep.mubr.f32.mxu1 %v814_v56 }
  0x74   :  { %440 = vmatprep.subr.mxu0 %v237_v10  ;;  %538 = vmatmul.mubr.f32.vlgmr.msra.gmra.mxu1 %v820_v63 }
  0x75   :  { %441 = vmatpush2.msra.mxu0 %v236_v11  ;;  %466 = vmatprep.mubr.f32.mxu0 %v814_v56  ;;  %v188_v56 = vld [vmem:[#allocation2 + $0x4c0] sm:$0xff] }
  0x76   :  { %442 = vmatprep.subr.mxu0 %v230_v12  ;;  %711 = vmatprep.subr.mxu1 %v776_v36 }
  0x77   :  { %443 = vmatpush2.msra.mxu0 %v229_v13  ;;  %712 = vmatpush3.msra.mxu1 %v573_v35 }
  0x78   :  { %444 = vmatprep.subr.mxu0 %v223_v14  ;;  %713 = vmatprep.subr.mxu1 %v776_v36 }
  0x79   :  { %445 = vmatpush2.msra.mxu0 %v222_v15  ;;  %714 = vmatpush3.msra.mxu1 %v572_v37 }
  0x7a   :  { %446 = vmatprep.subr.mxu0 %v216_v16  ;;  %715 = vmatprep.subr.mxu1 %v776_v36 }
  0x7b   :  { %447 = vmatpush2.msra.mxu0 %v215_v17  ;;  %716 = vmatpush3.msra.mxu1 %v571_v38 }
  0x7c   :  { %448 = vmatprep.subr.mxu0 %v209_v18  ;;  %717 = vmatprep.subr.mxu1 %v776_v36 }
  0x7d   :  { %449 = vmatpush2.msra.mxu0 %v208_v19  ;;  %743 = vmatprep.mubr.msk.f32.mxu1 %vm777_vm0, %v776_v36 }
  0x7e   :  { %450 = vmatprep.subr.mxu0 %v202_v20 }
  0x7f   :  { %451 = vmatpush2.msra.mxu0 %v201_v21 }
  0x80   :  { %452 = vmatprep.subr.mxu0 %v195_v22 }
  0x81   :  { %453 = vmatpush2.msra.mxu0 %v194_v23 }
  0x82   :  { %454 = vmatprep.subr.mxu0 %v188_v56 }
  0x83   :  { %455 = vmatpush2.msra.mxu0 %v187_v24 }
  0x84   :  { %456 = vmatprep.subr.mxu0 %v181_v25 }
  0x85   :  { %457 = vmatpush2.msra.mxu0 %v180_v26 }
  0x86   :  { %458 = vmatprep.subr.mxu0 %v174_v27 }
  0x87   :  { %459 = vmatpush2.msra.mxu0 %v173_v28 }
  0x88   :  { %460 = vmatprep.subr.mxu0 %v167_v29 }
  0x89   :  { %461 = vmatpush2.msra.mxu0 %v166_v30 }
  0x8a   :  { %462 = vmatprep.subr.mxu0 %v160_v31 }
  0x8b   :  { %463 = vmatpush2.msra.mxu0 %v159_v32 }
  0x8c   :  { %464 = vmatprep.subr.mxu0 %v153_v33 }
  0x8d   :  { %465 = vmatpush2.msra.mxu0 %v152_v34 }
  0x8e   :  { %467 = vmatmul.mubr.f32.vlgmr.msra.gmra.mxu0 %v820_v63  ;;  %v570_v63 = vld [vmem:[%s888_s2 + $0x60] sm:$0xff] }
  0x8f   :  { %718 = vmatpush3.msra.mxu1 %v570_v63 }
  0x90   :  { %719 = vmatprep.subr.mxu1 %v776_v36 }
  0x91   :  { %720 = vmatpush3.msra.mxu1 %v569_v39 }
  0x92   :  { %721 = vmatprep.subr.mxu1 %v776_v36 }
  0x93   :  { %722 = vmatpush3.msra.mxu1 %v568_v40 }
  0x94   :  { %723 = vmatprep.subr.mxu1 %v776_v36 }
  0x95   :  { %724 = vmatpush3.msra.mxu1 %v567_v41 }
  0x96   :  { %725 = vmatprep.subr.mxu1 %v776_v36 }
  0x97   :  { %726 = vmatpush3.msra.mxu1 %v566_v42 }
  0x98   :  { %727 = vmatprep.subr.mxu1 %v776_v36 }
  0x99   :  { %728 = vmatpush3.msra.mxu1 %v565_v43 }
  0x9a   :  { %729 = vmatprep.subr.mxu1 %v776_v36 }
  0x9b   :  { %730 = vmatpush3.msra.mxu1 %v564_v44 }
  0x9c   :  { %731 = vmatprep.subr.mxu1 %v776_v36 }
  0x9d   :  { %732 = vmatpush3.msra.mxu1 %v563_v45 }
  0x9e   :  { %733 = vmatprep.subr.mxu1 %v776_v36 }
  0x9f   :  { %734 = vmatpush3.msra.mxu1 %v562_v46 }
  0xa0   :  { %735 = vmatprep.subr.mxu1 %v776_v36 }
  0xa1   :  { %736 = vmatpush3.msra.mxu1 %v561_v47 }
  0xa2   :  { %737 = vmatprep.subr.mxu1 %v776_v36 }
  0xa3   :  { %738 = vmatpush3.msra.mxu1 %v560_v48 }
  0xa4   :  { %739 = vmatprep.subr.mxu1 %v776_v36 }
  0xa5   :  { %740 = vmatpush3.msra.mxu1 %v559_v49 }
  0xa6   :  { %741 = vmatprep.subr.mxu1 %v776_v36 }
  0xa7   :  { %742 = vmatpush3.msra.mxu1 %v558_v50 }
 0x10e   :  { %v326_v51 = vpop.f32.mrf.mxu0 }
 0x110   :  { %v328_v52 = vpop.f32.mrf.mxu0 }
 0x111   :  { %v543_v54 = vmax.f32 %v326_v51, %v328_v52 }
 0x112   :  { %v397_v53 = vpop.f32.mrf.mxu1 }
 0x113   :  { %v544_v57 = vmax.f32 %v543_v54, %v397_v53 }
 0x114   :  { %v399_v55 = vpop.f32.mrf.mxu1 }
 0x115   :  { %v545_v59 = vmax.f32 %v544_v57, %v399_v55 }
 0x134   :  { %v691_v58 = vpop.f32.mrf.mxu1 }
 0x136   :  { %v692_v61 = vpop.f32.mrf.mxu1 }
 0x137   :  { %v693_v1 = vadd.f32 %v692_v61, %v691_v58 }
 0x14e   :  { %v468_v60 = vpop.f32.mrf.mxu0 }
 0x14f   :  { %v546_v62 = vmax.f32 %v545_v59, %v468_v60 }
 0x150   :  { %v470_v0 = vpop.f32.mrf.mxu0 }
 0x151   :  { %v547_v2 = vmax.f32 %v546_v62, %v470_v0 }
 0x153   :  { %v548_v4 = vmax.f32 %v547_v2, %v693_v1 }
 0x155   :  { %v556_v5 = vadd.f32 %v657_v3, %v548_v4 }
 0x157   :  { %v557_v6 = vmax.f32 %v556_v5, 0.0 }
 0x159   :  { %744 = vmatmul.mubr.f32.vlgmr.msra.gmra.mxu1 %v557_v6 }
 0x219   :  { %v647_v8 = vpop.f32.mrf.mxu1 }
 0x21a   :  { %v648_v9 = vadd.f32 %v658_v7, %v647_v8 }
 0x21b   :  { %v745_v10 = vpop.f32.mrf.mxu1 }
 0x21c   :  { %651 = vst [vmem:[%s891_s5] sm:$0xff] %v648_v9 }
 0x21d   :  { %656 = vsyncpa [#allocation3], 1 }

</bundles_post_ra>
